<compile_context>
chip_gen: v7x
topology: tpu7x:2x2x1
jax: 0.10.0
libtpu: 0.0.40
codegen_flags: <defaults>
</compile_context>

<pallas_src>
import functools

import jax
import jax.numpy as jnp
from jax.experimental import pallas as pl
from jax.experimental.pallas import tpu as pltpu


def _choose_row_tile(batch, num_classes):
    """Batch-row tile: full batch when small, else a VMEM-friendly multiple of 16."""
    # Keep one f32 logits block around <= ~8 MiB so two double-buffered input
    # blocks + temporaries fit comfortably on every generation.
    target_block_bytes = 8 * 1024 * 1024
    cap = max(16, (target_block_bytes // (num_classes * 4)) // 16 * 16)
    tile = min(512, cap)
    if batch <= tile:
        return batch  # single block == full array dim (always a legal block shape)
    return tile


def _make_reduce_kernel(num_classes, epsilon, sparse_target, reduction,
                        batch, row_tile, needs_mask):
    eps = float(epsilon)
    one_minus_eps = 1.0 - eps
    eps_over_c = eps / float(num_classes)
    scale = (1.0 / float(batch)) if reduction == "avg" else 1.0

    def kernel(logits_ref, target_ref, out_ref, acc_ref):
        i = pl.program_id(0)

        @pl.when(i == 0)
        def _():
            acc_ref[0] = jnp.float32(0.0)

        x = logits_ref[...].astype(jnp.float32)                      # [TB, C]

        # Numerically-stable logsumexp along the class (lane) dim.
        m = jnp.max(x, axis=-1, keepdims=True)                       # XLU reduce
        shifted = x - m                                              # [TB, C]
        logz = jnp.log(jnp.sum(jnp.exp(shifted), axis=-1, keepdims=True))  # [TB,1]
        sum_shifted = jnp.sum(shifted, axis=-1, keepdims=True)       # [TB, 1]

        if sparse_target:
            tgt = target_ref[...]                                    # [TB, 1] int32
            col = jax.lax.broadcasted_iota(jnp.int32, x.shape, 1)
            t_dot_shift = jnp.sum(
                jnp.where(col == tgt, shifted, 0.0), axis=-1, keepdims=True)
            t_sum = jnp.float32(1.0)
        else:
            t = target_ref[...].astype(jnp.float32)                  # [TB, C]
            t_dot_shift = jnp.sum(t * shifted, axis=-1, keepdims=True)
            t_sum = jnp.sum(t, axis=-1, keepdims=True)

        # Per-row loss without materializing log_probs / smoothed targets / loss:
        #   -(1-eps)*(<t,shifted> - logZ*sum_t) - (eps/C)*(sum_shifted - C*logZ)
        row_loss = (logz * (one_minus_eps * t_sum + eps)
                    - one_minus_eps * t_dot_shift
                    - eps_over_c * sum_shifted)                      # [TB, 1]

        if needs_mask:
            row = (jax.lax.broadcasted_iota(jnp.int32, row_loss.shape, 0)
                   + i * row_tile)
            row_loss = jnp.where(row < batch, row_loss, 0.0)

        acc_ref[0] = acc_ref[0] + jnp.sum(row_loss)

        @pl.when(i == pl.num_programs(0) - 1)
        def _():
            out_ref[0, 0] = acc_ref[0] * scale

    return kernel


def _make_elementwise_kernel(num_classes, epsilon, sparse_target):
    on_value = 1.0 - float(epsilon)
    off_value = float(epsilon) / float(num_classes)

    def kernel(logits_ref, target_ref, out_ref):
        x = logits_ref[...].astype(jnp.float32)                      # [TB, C]
        m = jnp.max(x, axis=-1, keepdims=True)
        shifted = x - m
        logz = jnp.log(jnp.sum(jnp.exp(shifted), axis=-1, keepdims=True))
        log_probs = shifted - logz

        if sparse_target:
            tgt = target_ref[...]                                    # [TB, 1] int32
            col = jax.lax.broadcasted_iota(jnp.int32, x.shape, 1)
            onehot = (col == tgt).astype(jnp.float32)
        else:
            onehot = target_ref[...].astype(jnp.float32)             # [TB, C]

        targets = on_value * onehot + off_value
        out_ref[...] = (-targets * log_probs).astype(out_ref.dtype)

    return kernel


@functools.partial(
    jax.jit,
    static_argnames=("num_classes", "epsilon", "sparse_target", "reduction"),
)
def _cross_entropy_label_smooth(
    logits, target, *, num_classes, epsilon, sparse_target, reduction
):
    B, C = logits.shape
    assert C == num_classes

    row_tile = _choose_row_tile(B, C)
    num_blocks = -(-B // row_tile)          # cdiv
    b_pad = num_blocks * row_tile
    needs_pad = b_pad != B

    if needs_pad:
        logits = jnp.pad(logits, ((0, b_pad - B), (0, 0)))

    if sparse_target:
        tgt = target.reshape(B).astype(jnp.int32)
        if needs_pad:
            tgt = jnp.pad(tgt, (0, b_pad - B))
        tgt = tgt.reshape(b_pad, 1)
        tgt_spec = pl.BlockSpec((row_tile, 1), lambda i: (i, 0))
    else:
        tgt = target
        if needs_pad:
            tgt = jnp.pad(tgt, ((0, b_pad - B), (0, 0)))
        tgt_spec = pl.BlockSpec((row_tile, C), lambda i: (i, 0))

    logits_spec = pl.BlockSpec((row_tile, C), lambda i: (i, 0))

    # VMEM budget: raise v5e's 16 MiB default, keep headroom under v7x's 64 MiB.
    block_bytes = row_tile * C * 4
    vmem_limit = int(min(56 * 2**20, max(32 * 2**20, 5 * block_bytes)))

    in_bytes = (logits.size * logits.dtype.itemsize
                + tgt.size * tgt.dtype.itemsize)

    if reduction in ("avg", "sum"):
        kernel = _make_reduce_kernel(
            num_classes, epsilon, sparse_target, reduction,
            B, row_tile, needs_pad)
        out = pl.pallas_call(
            kernel,
            grid=(num_blocks,),
            in_specs=[logits_spec, tgt_spec],
            out_specs=pl.BlockSpec(memory_space=pltpu.MemorySpace.SMEM),
            out_shape=jax.ShapeDtypeStruct((1, 1), jnp.float32),
            scratch_shapes=[pltpu.SMEM((1,), jnp.float32)],
            compiler_params=pltpu.CompilerParams(
                dimension_semantics=("arbitrary",),
                vmem_limit_bytes=vmem_limit),
            cost_estimate=pl.CostEstimate(
                flops=8 * b_pad * C,
                transcendentals=b_pad * C,
                bytes_accessed=in_bytes + 4),
        )(logits, tgt)
        return out[0, 0]

    # reduction == 'none' (elementwise loss matrix), emitted in the input dtype.
    out_dtype = logits.dtype
    kernel = _make_elementwise_kernel(num_classes, epsilon, sparse_target)
    out = pl.pallas_call(
        kernel,
        grid=(num_blocks,),
        in_specs=[logits_spec, tgt_spec],
        out_specs=pl.BlockSpec((row_tile, C), lambda i: (i, 0)),
        out_shape=jax.ShapeDtypeStruct((b_pad, C), out_dtype),
        compiler_params=pltpu.CompilerParams(
            dimension_semantics=("parallel",),
            vmem_limit_bytes=vmem_limit),
        cost_estimate=pl.CostEstimate(
            flops=10 * b_pad * C,
            transcendentals=b_pad * C,
            bytes_accessed=in_bytes + b_pad * C * jnp.dtype(out_dtype).itemsize),
    )(logits, tgt)
    if needs_pad:
        out = out[:B]
    return out


class CrossEntropyLabelSmooth:
    """JAX/Pallas equivalent of the PyTorch CrossEntropyLabelSmooth module."""

    def __init__(self, num_classes, epsilon=0.1, sparse_target=True, reduction="avg"):
        self.num_classes = int(num_classes)
        self.epsilon = float(epsilon)
        self.sparse_target = bool(sparse_target)
        self.reduction = reduction

    def __call__(self, input, target):
        return _cross_entropy_label_smooth(
            input,
            target,
            num_classes=self.num_classes,
            epsilon=self.epsilon,
            sparse_target=self.sparse_target,
            reduction=self.reduction,
        )


def _reference(logits, target_onehot, num_classes, eps, reduction):
    lp = jax.nn.log_softmax(logits.astype(jnp.float32), axis=1)
    t = (1.0 - eps) * target_onehot + eps / num_classes
    loss = -t * lp
    if reduction == "avg":
        return loss.mean(0).sum()
    if reduction == "sum":
        return loss.sum()
    return loss


if __name__ == "__main__":
    key = jax.random.PRNGKey(0)
    k_logits, k_tgt, k_logits2, k_tgt2 = jax.random.split(key, 4)

    batch, num_classes = 8, 32
    logits = jax.random.normal(k_logits, (batch, num_classes), jnp.float32)
    target = jax.random.randint(k_tgt, (batch,), 0, num_classes, jnp.int32)
    target_onehot = jax.nn.one_hot(target, num_classes, dtype=jnp.float32)

    # Default path: sparse targets, 'avg' reduction.
    module = CrossEntropyLabelSmooth(num_classes, epsilon=0.1,
                                     sparse_target=True, reduction="avg")
    loss = jax.block_until_ready(module(logits, target))
    ref = _reference(logits, target_onehot, num_classes, 0.1, "avg")
    assert loss.shape == ref.shape
    assert jnp.allclose(loss, ref, atol=1e-5, rtol=1e-5)

    # 'sum' reduction.
    module_sum = CrossEntropyLabelSmooth(num_classes, reduction="sum")
    loss_sum = jax.block_until_ready(module_sum(logits, target))
    ref_sum = _reference(logits, target_onehot, num_classes, 0.1, "sum")
    assert jnp.allclose(loss_sum, ref_sum, atol=1e-5, rtol=1e-5)

    # Dense (non-sparse) target path.
    module_dense = CrossEntropyLabelSmooth(num_classes, sparse_target=False)
    loss_dense = jax.block_until_ready(module_dense(logits, target_onehot))
    assert jnp.allclose(loss_dense, ref, atol=1e-5, rtol=1e-5)

    # Elementwise (no reduction) path.
    module_none = CrossEntropyLabelSmooth(num_classes, reduction="none")
    loss_none = jax.block_until_ready(module_none(logits, target))
    ref_none = _reference(logits, target_onehot, num_classes, 0.1, "none")
    assert loss_none.shape == ref_none.shape
    assert jnp.allclose(loss_none, ref_none, atol=1e-5, rtol=1e-5)

    # Exercise the tiled + padded/masked batch-grid path (B > row tile, B % tile != 0).
    big_b = 600
    logits_big = jax.random.normal(k_logits2, (big_b, num_classes), jnp.float32)
    target_big = jax.random.randint(k_tgt2, (big_b,), 0, num_classes, jnp.int32)
    onehot_big = jax.nn.one_hot(target_big, num_classes, dtype=jnp.float32)
    loss_big = jax.block_until_ready(module(logits_big, target_big))
    ref_big = _reference(logits_big, onehot_big, num_classes, 0.1, "avg")
    assert jnp.allclose(loss_big, ref_big, atol=1e-5, rtol=1e-5)

    print("KERNEL_OK")
</pallas_src>

<mosaic_0001>
module attributes {stable_mosaic.version = 11 : i64} {
  func.func @kernel(%arg0: i32, %arg1: memref<8x32xf32, #tpu.memory_space<vmem>>, %arg2: memref<8x1xi32, #tpu.memory_space<vmem>>, %arg3: memref<1x1xf32, #tpu.memory_space<smem>>, %arg4: memref<1xf32, #tpu.memory_space<smem>>) attributes {dimension_semantics = [#tpu.dimension_semantics<arbitrary>], iteration_bounds = array<i64: 1>, scalar_prefetch = 0 : i64, scratch_operands = 1 : i64, tpu.core_type = #tpu.core_type<tc>, window_params = [{transform_indices = @transform_0, window_bounds = array<i64: 8, 32>}, {transform_indices = @transform_1, window_bounds = array<i64: 8, 1>}, {transform_indices = @transform_2, window_bounds = array<i64: 1, 1>}]} {
    %c0_i32 = arith.constant 0 : i32
    %0 = arith.cmpi eq, %arg0, %c0_i32 : i32
    %1 = arith.extui %0 : i1 to i32
    %c0_i32_0 = arith.constant 0 : i32
    %2 = arith.cmpi ne, %1, %c0_i32_0 : i32
    scf.if %2 {
      %cst_18 = arith.constant 0.000000e+00 : f32
      %c0_19 = arith.constant 0 : index
      %42 = memref.load %arg4[%c0_19] : memref<1xf32, #tpu.memory_space<smem>>
      memref.store %cst_18, %arg4[%c0_19] : memref<1xf32, #tpu.memory_space<smem>>
    } else {
    }
    %c0 = arith.constant 0 : index
    %c0_1 = arith.constant 0 : index
    %3 = vector.load %arg1[%c0, %c0_1] : memref<8x32xf32, #tpu.memory_space<vmem>>, vector<8x32xf32>
    %cst = arith.constant dense<0xFF800000> : vector<8xf32>
    %4 = vector.multi_reduction <maximumf>, %3, %cst [1] : vector<8x32xf32> to vector<8xf32>
    %5 = vector.shape_cast %4 : vector<8xf32> to vector<8x1xf32>
    %6 = vector.broadcast %5 : vector<8x1xf32> to vector<8x32xf32>
    %7 = arith.subf %3, %6 : vector<8x32xf32>
    %8 = math.exp %7 : vector<8x32xf32>
    %cst_2 = arith.constant dense<0.000000e+00> : vector<8xf32>
    %9 = vector.multi_reduction <add>, %8, %cst_2 [1] : vector<8x32xf32> to vector<8xf32>
    %10 = vector.shape_cast %9 : vector<8xf32> to vector<8x1xf32>
    %11 = math.log %10 : vector<8x1xf32>
    %cst_3 = arith.constant dense<0.000000e+00> : vector<8xf32>
    %12 = vector.multi_reduction <add>, %7, %cst_3 [1] : vector<8x32xf32> to vector<8xf32>
    %13 = vector.shape_cast %12 : vector<8xf32> to vector<8x1xf32>
    %c0_4 = arith.constant 0 : index
    %c0_5 = arith.constant 0 : index
    %14 = vector.load %arg2[%c0_4, %c0_5] : memref<8x1xi32, #tpu.memory_space<vmem>>, vector<8x1xi32>
    %15 = tpu.iota {dimensions = array<i32: 1>} : vector<8x32xi32>
    %16 = vector.broadcast %14 : vector<8x1xi32> to vector<8x32xi32>
    %17 = arith.cmpi eq, %15, %16 : vector<8x32xi32>
    %cst_6 = arith.constant 0.000000e+00 : f32
    %18 = vector.broadcast %cst_6 : f32 to vector<8x32xf32>
    %19 = arith.select %17, %7, %18 : vector<8x32xi1>, vector<8x32xf32>
    %cst_7 = arith.constant dense<0.000000e+00> : vector<8xf32>
    %20 = vector.multi_reduction <add>, %19, %cst_7 [1] : vector<8x32xf32> to vector<8xf32>
    %21 = vector.shape_cast %20 : vector<8xf32> to vector<8x1xf32>
    %cst_8 = arith.constant 0.899999976 : f32
    %cst_9 = arith.constant 1.000000e+00 : f32
    %22 = arith.mulf %cst_8, %cst_9 : f32
    %cst_10 = arith.constant 1.000000e-01 : f32
    %23 = arith.addf %22, %cst_10 : f32
    %24 = vector.broadcast %23 : f32 to vector<8x1xf32>
    %25 = arith.mulf %11, %24 : vector<8x1xf32>
    %cst_11 = arith.constant 0.899999976 : f32
    %26 = vector.broadcast %cst_11 : f32 to vector<8x1xf32>
    %27 = arith.mulf %26, %21 : vector<8x1xf32>
    %28 = arith.subf %25, %27 : vector<8x1xf32>
    %cst_12 = arith.constant 3.125000e-03 : f32
    %29 = vector.broadcast %cst_12 : f32 to vector<8x1xf32>
    %30 = arith.mulf %29, %13 : vector<8x1xf32>
    %31 = arith.subf %28, %30 : vector<8x1xf32>
    %c0_13 = arith.constant 0 : index
    %32 = memref.load %arg4[%c0_13] : memref<1xf32, #tpu.memory_space<smem>>
    %33 = vector.shape_cast %31 : vector<8x1xf32> to vector<1x8x1xf32>
    %cst_14 = arith.constant dense<0.000000e+00> : vector<1xf32>
    %34 = vector.multi_reduction <add>, %33, %cst_14 [1, 2] : vector<1x8x1xf32> to vector<1xf32>
    %35 = vector.shape_cast %34 : vector<1xf32> to vector<1x1x1xf32>
    %36 = vector.extract %35[0, 0, 0] : f32 from vector<1x1x1xf32>
    %37 = arith.addf %32, %36 : f32
    %c0_15 = arith.constant 0 : index
    %38 = memref.load %arg4[%c0_15] : memref<1xf32, #tpu.memory_space<smem>>
    memref.store %37, %arg4[%c0_15] : memref<1xf32, #tpu.memory_space<smem>>
    %c0_i32_16 = arith.constant 0 : i32
    %39 = arith.cmpi eq, %arg0, %c0_i32_16 : i32
    %40 = arith.extui %39 : i1 to i32
    %c0_i32_17 = arith.constant 0 : i32
    %41 = arith.cmpi ne, %40, %c0_i32_17 : i32
    scf.if %41 {
      %c0_18 = arith.constant 0 : index
      %42 = memref.load %arg4[%c0_18] : memref<1xf32, #tpu.memory_space<smem>>
      %cst_19 = arith.constant 1.250000e-01 : f32
      %43 = arith.mulf %42, %cst_19 : f32
      %c0_20 = arith.constant 0 : index
      %c0_21 = arith.constant 0 : index
      %44 = memref.load %arg3[%c0_20, %c0_21] : memref<1x1xf32, #tpu.memory_space<smem>>
      memref.store %43, %arg3[%c0_20, %c0_21] : memref<1x1xf32, #tpu.memory_space<smem>>
    } else {
    }
    return
  }
  func.func @transform_0(%arg0: i32) -> (i32, i32) {
    %c0_i32 = arith.constant 0 : i32
    %c0_i32_0 = arith.constant 0 : i32
    return %arg0, %c0_i32 : i32, i32
  }
  func.func @transform_1(%arg0: i32) -> (i32, i32) {
    %c0_i32 = arith.constant 0 : i32
    %c0_i32_0 = arith.constant 0 : i32
    return %arg0, %c0_i32 : i32, i32
  }
  func.func @transform_2(%arg0: i32) -> (i32, i32) {
    %c0_i32 = arith.constant 0 : i32
    %c0_i32_0 = arith.constant 0 : i32
    %c0_i32_1 = arith.constant 0 : i32
    return %c0_i32, %c0_i32_0 : i32, i32
  }
}

</mosaic_0001>

<bundles_post_ra>
// kernel: _cross_entropy_label_smooth.1
= control target key start
LH: loop header
LB: loop body
LE: loop exit
PB: predicated region body
PF: predicated region fallthrough
CT: control target
= control target key end

     0   :  { %vm19_vm0 = vcmask 261120   ;;  %s144_s0 = inlined_call_operand.vmem [shape: f32[8,32], index: 0, kind: input, shape index: {}]   ;;  %s145_s1 = inlined_call_operand.vmem [shape: s32[8,1], index: 1, kind: input, shape index: {}]   ;;  %s146_s2 = inlined_call_operand.hbm [shape: f32[1,1], index: 2, kind: output, shape index: {}]  }
   0x1   :  { %v18_v0 = vld [vmem:[%s144_s0] sm:$0xff] }
   0x2   :  { %7 = vsyncpa [#allocation4], 0  ;;  %v20_v1 = vsel %vm19_vm0, %v18_v0, -inf  ;;  %v105_v2 = vmov 0   ;;  %v34_v3 = vld [vmem:[%s145_s1] sm:$0xff]  ;;  %v35_v7 = vlaneseq  ;;  %vm50_vm2 = vcmask 7168  }
   0x3   :  { %88 = vset.pattern.permute.xlu0 %v105_v2  ;;  %s93_s15 = scalar_lea.hbm %s146_s2, 16 }
   0x4   :  { %21 = vmax.xlane.f32.xlu0 %v20_v1  ;;  %v36_v8 = vand.u32 127, %v35_v7  ;;  %p94_p0 = scmp.ne.s32.totalorder %s146_s2, %s93_s15  ;;  %p97_p1 = scmp.lt.u32.totalorder %s93_s15, %s146_s2 }
   0x6   :  { %p99_p2 = pnand %p97_p1, %p94_p0 }
  0x1a   :  { %38 = vperm.xlu0 %88, %v34_v3  }
  0x91   :  { %v22_v4 = vpop.xlane.xlu0 %21 }
  0x92   :  { %v23_v5 = vsub.f32 %v18_v0, %v22_v4 }
  0x94   :  { %v24_v6 = vmul.f32 1.442695, %v23_v5  ;;  %v31_v14 = vsel %vm19_vm0, %v23_v5, 0.0 }
  0x96   :  { %89 = vpow2.f32 %v24_v6 }
  0x99   :  { %v39_v9 = vpop.permute.xlu0 %38 }
  0x9a   :  { %vm40_vm1 = vcmp.eq.s32.totalorder %v36_v8, %v39_v9 }
  0x9b   :  { %v41_v12 = vsel %vm40_vm1, %v23_v5, 0.0 }
  0x9c   :  { %v42_v13 = vsel %vm19_vm0, %v41_v12, 0.0 }
  0xa0   :  { %v90_v10 = vpop.eup %89 }
  0xa1   :  { %v26_v11 = vsel %vm19_vm0, %v90_v10, 0.0 }
  0xa2   :  { %27 = vadd.xlane.f32.xlu1 %v26_v11 }
  0xa6   :  { %43 = vadd.xlane.f32.xlu1 %v42_v13 }
  0xaa   :  { %32 = vadd.xlane.f32.xlu1 %v31_v14 }
 0x12f   :  { %v28_v15 = vpop.xlane.xlu1 %27 }
 0x130   :  { %91 = vlog2.f32 %v28_v15 }
 0x133   :  { %v44_v16 = vpop.xlane.xlu1 %43 }
 0x134   :  { %v45_v20 = vmul.f32 0.9, %v44_v16 }
 0x137   :  { %v33_v18 = vpop.xlane.xlu1 %32 }
 0x138   :  { %v47_v22 = vmul.f32 0.003125, %v33_v18 }
 0x13a   :  { %v92_v17 = vpop.eup %91 }
 0x13b   :  { %v30_v19 = vmul.f32 0.6931472, %v92_v17 }
 0x13d   :  { %v46_v21 = vsub.f32 %v30_v19, %v45_v20 }
 0x13f   :  { %v48_v23 = vsub.f32 %v46_v21, %v47_v22 }
 0x141   :  { %v51_v24 = vsel %vm50_vm2, %v48_v23, 0.0 }
 0x142   :  { %52 = vadd.xlane.f32.xlu1 %v51_v24 }
 0x1cf   :  { %v53_v25 = vpop.xlane.xlu1 %52 }
 0x1d0   :  { %v54_v26 = vrot.slane %v53_v25, 4 }
 0x1d2   :  { %v55_v27 = vadd.f32 %v54_v26, %v53_v25 }
 0x1d4   :  { %v56_v28 = vrot.slane %v55_v27, 2 }
 0x1d6   :  { %v57_v29 = vadd.f32 %v56_v28, %v55_v27 }
 0x1d8   :  { %v58_v30 = vrot.slane %v57_v29, 1 }
 0x1da   :  { %v59_v31 = vadd.f32 %v58_v30, %v57_v29 }
 0x1dc   :  { %84 = vpush %v59_v31 }
 0x20d   :  { %s85_s0 = spop %84 }
 0x20e   :  { %s68_s1 = smul.f32 0.125, %s85_s0 }
 0x210   :  { %70 = sst [smem:[#allocation3]] %s68_s1 }
 0x211   :  { %102 = shalt.err (!%p99_p2)
}
 0x212   :  { %s106_s20 = smov [#allocation3]  }
 0x213   :  { %78 = dma.smem_to_hbm %s106_s20, 16, %s146_s2, [#allocation4]  }
 0x214   :  { %103 = dma.done.wait [#allocation4], 16  }
 0x215   :  { %104 = vsyncadd [#allocation4], 4294967280 }
 0x216   :  { %82 = sfence }
 0x217   :  { %83 = vsyncpa [#allocation4], 1 }

</bundles_post_ra>
